<compile_context>
chip_gen: v7x
topology: tpu7x:2x2x1
jax: 0.10.0
libtpu: 0.0.40
codegen_flags: <defaults>
</compile_context>

<pallas_src>
import functools

import jax
import jax.numpy as jnp
from jax.experimental import pallas as pl
from jax.experimental.pallas import tpu as pltpu

LN_EPS = 1e-5


def gc_kernel(x_ref,      # (Bb, C, HW)  io dtype
              wm_ref,     # (1, 1, C)    io dtype  conv_mask weight
              bm_ref,     # (1, 1)       f32 SMEM  conv_mask bias
              w1t_ref,    # (C, P)       io dtype  channel_add_conv[0].weight^T
              b1_ref,     # (1, P)       f32       channel_add_conv[0].bias
              g_ref,      # (1, P)       f32       LayerNorm gamma
              bt_ref,     # (1, P)       f32       LayerNorm beta
              w2t_ref,    # (P, C)       io dtype  channel_add_conv[3].weight^T
              b2_ref,     # (1, C)       f32       channel_add_conv[3].bias
              out_ref,    # (Bb, C, HW)  io dtype
              *, approx_recip: bool):
    x = x_ref[...]                                   # io dtype; no f32 widen pass
    bb, c, hw = x.shape

    # ---- spatial_pool: 1x1 conv_mask + softmax over HW (all f32 math) -------
    wm = jnp.broadcast_to(wm_ref[...], (bb, 1, c))                    # tiny
    logits = jnp.einsum("boc,bcs->bos", wm, x,
                        preferred_element_type=jnp.float32)           # (Bb,1,HW)
    logits = logits + bm_ref[0, 0]      # constant per map (softmax-invariant)

    m = jnp.max(logits, axis=-1, keepdims=True)                       # (Bb,1,1)
    e = jnp.exp(logits - m)                                           # (Bb,1,HW)
    s = jnp.sum(e, axis=-1, keepdims=True)                            # (Bb,1,1)

    # Unnormalized context; rescale the tiny (Bb,C) vector by 1/s afterwards.
    ctx = jnp.einsum("bos,bcs->boc", e.astype(x.dtype), x,
                     preferred_element_type=jnp.float32)              # (Bb,1,C)
    inv_s = pl.reciprocal(s, approx=approx_recip)
    ctx = (ctx * inv_s)[:, 0, :]                                      # (Bb, C)

    # ---- channel_add_conv: 1x1 -> LayerNorm([P,1,1]) -> ReLU -> 1x1 ---------
    y1 = jnp.dot(ctx.astype(w1t_ref.dtype), w1t_ref[...],
                 preferred_element_type=jnp.float32) + b1_ref[...]    # (Bb, P)
    mu = jnp.mean(y1, axis=-1, keepdims=True)
    var = jnp.mean(jnp.square(y1 - mu), axis=-1, keepdims=True)
    y1 = (y1 - mu) * jax.lax.rsqrt(var + LN_EPS)
    y1 = y1 * g_ref[...] + bt_ref[...]
    y1 = jnp.maximum(y1, 0.0)                                         # ReLU
    y2 = jnp.dot(y1.astype(w2t_ref.dtype), w2t_ref[...],
                 preferred_element_type=jnp.float32) + b2_ref[...]    # (Bb, C)

    # ---- residual add in io dtype (broadcast channel term over HW) ----------
    out_ref[...] = (x + y2.astype(x.dtype)[:, :, None]).astype(out_ref.dtype)


def _vmem_capacity_bytes():
    try:
        return int(pltpu.get_tpu_info().vmem_capacity_bytes)
    except Exception:  # pragma: no cover - conservative fallback (v7x per-TC)
        return 64 * 1024 * 1024


def _choose_block_batch(batch, c, hw, io_itemsize, cap):
    """Largest divisor of `batch` whose x block fits the per-generation budget."""
    blk_budget = (8 << 20) if cap <= (64 << 20) else (12 << 20)
    per_b = max(1, c * hw * io_itemsize)
    bb = max(1, min(batch, blk_budget // per_b))
    if batch >= 2:
        # Keep >= 2 grid steps so the 'parallel' axis can shard across v7x's
        # two TensorCores (and the pipeline has something to overlap).
        bb = min(bb, max(1, batch // 2))
    while batch % bb:
        bb -= 1
    return bb


def _vmem_limit_bytes(bb, c, hw, p, io_itemsize, cap):
    """Derive vmem_limit from the real allocation instead of a constant."""
    x_blk = bb * c * hw * io_itemsize                   # one x (or out) block
    params = (c + 2 * c * p) * io_itemsize + (3 * p + 2 * c + 8) * 4
    temps = 3 * bb * hw * 4 + bb * (2 * c + 4 * p) * 4  # f32 logits/e + vectors
    need = 4 * x_blk + 2 * params + temps + (2 << 20)   # 2x in + 2x out + slack
    return int(min(max(need, 16 << 20), int(cap * 0.75)))


def global_context_block(x, params, *, io_dtype=None, block_batch=None):
    """x: (B, C, H, W). params: dict of PyTorch-layout weights (see init_params)."""
    B, C, H, W = x.shape
    HW = H * W
    P = params["w1"].shape[0]

    # Default to the producer's dtype so the wrapper never adds an extra HBM
    # cast pass; feed bf16 x (or set io_dtype) to halve HBM traffic.
    io_dtype = jnp.dtype(x.dtype if io_dtype is None else io_dtype)
    x_flat = x.reshape(B, C, HW).astype(io_dtype)   # reshape = free; cast only if asked

    itemsize = io_dtype.itemsize
    cap = _vmem_capacity_bytes()
    Bb = (_choose_block_batch(B, C, HW, itemsize, cap)
          if block_batch is None else block_batch)
    assert B % Bb == 0, "block_batch must divide the batch size"
    vmem_limit = _vmem_limit_bytes(Bb, C, HW, P, itemsize, cap)

    # Tiny parameters, reshaped once into kernel-friendly row layouts.  The two
    # GEMM weights follow the I/O dtype (native MXU bf16 + less VMEM); biases
    # and LayerNorm affine stay f32 (applied after f32 accumulation).
    f32 = jnp.float32
    wm = params["wm"].astype(io_dtype).reshape(1, 1, C)
    bm = params["bm"].astype(f32).reshape(1, 1)
    w1t = params["w1"].astype(io_dtype).T              # (C, P)
    b1 = params["b1"].astype(f32).reshape(1, P)
    g = params["gamma"].astype(f32).reshape(1, P)
    bt = params["beta"].astype(f32).reshape(1, P)
    w2t = params["w2"].astype(io_dtype).T              # (P, C)
    b2 = params["b2"].astype(f32).reshape(1, C)

    kernel = functools.partial(gc_kernel,
                               approx_recip=(io_dtype == jnp.bfloat16))

    full2 = lambda i: (0, 0)      # noqa: E731  untiled full-array params
    full3 = lambda i: (0, 0, 0)   # noqa: E731

    flops = B * (C * (5 * HW + 4 * P) + 4 * HW)
    bytes_accessed = (2 * B * C * HW * itemsize
                      + (2 * C * P + C) * itemsize + (3 * P + 2 * C + 1) * 4)
    cost = pl.CostEstimate(flops=int(flops), transcendentals=int(B * HW),
                           bytes_accessed=int(bytes_accessed))

    # TODO(synk): when B == 1 the grid has a single step, so one v7x TensorCore
    # idles; a flash-style two-pass online softmax over spatial blocks would add
    # a second grid axis for that case.
    out_flat = pl.pallas_call(
        kernel,
        out_shape=jax.ShapeDtypeStruct((B, C, HW), io_dtype),
        grid_spec=pltpu.PrefetchScalarGridSpec(
            num_scalar_prefetch=0,
            grid=(B // Bb,),
            in_specs=[
                pl.BlockSpec((Bb, C, HW), lambda i: (i, 0, 0)),
                pl.BlockSpec((1, 1, C), full3),
                pl.BlockSpec(memory_space=pltpu.MemorySpace.SMEM),   # bm scalar
                pl.BlockSpec((C, P), full2),
                pl.BlockSpec((1, P), full2),
                pl.BlockSpec((1, P), full2),
                pl.BlockSpec((1, P), full2),
                pl.BlockSpec((P, C), full2),
                pl.BlockSpec((1, C), full2),
            ],
            out_specs=pl.BlockSpec((Bb, C, HW), lambda i: (i, 0, 0)),
        ),
        compiler_params=pltpu.CompilerParams(
            dimension_semantics=("parallel",),
            vmem_limit_bytes=vmem_limit),
        cost_estimate=cost,
    )(x_flat, wm, bm, w1t, b1, g, bt, w2t, b2)

    return out_flat.reshape(B, C, H, W)


def init_params(key, inplanes, ratio):
    planes = int(inplanes * ratio)
    ks = jax.random.split(key, 6)
    scale = 0.1
    return {
        # conv_mask: Conv2d(inplanes, 1, 1) -> weight (1, C, 1, 1) flattened to (1, C)
        "wm": scale * jax.random.normal(ks[0], (1, inplanes), jnp.float32),
        "bm": scale * jax.random.normal(ks[1], (1, 1), jnp.float32),
        # channel_add_conv[0]: Conv2d(C, P, 1) -> (P, C)
        "w1": scale * jax.random.normal(ks[2], (planes, inplanes), jnp.float32),
        "b1": scale * jax.random.normal(ks[3], (planes, 1), jnp.float32),
        # LayerNorm([P, 1, 1]) -> gamma/beta init 1 / 0 (PyTorch default)
        "gamma": jnp.ones((planes, 1), jnp.float32),
        "beta": jnp.zeros((planes, 1), jnp.float32),
        # channel_add_conv[3]: Conv2d(P, C, 1) -> (C, P)
        "w2": scale * jax.random.normal(ks[4], (inplanes, planes), jnp.float32),
        "b2": scale * jax.random.normal(ks[5], (inplanes, 1), jnp.float32),
    }


def reference(x, p):
    """Pure-JAX reference of the PyTorch forward (NCHW)."""
    B, C, H, W = x.shape
    xf = x.reshape(B, C, H * W)
    logits = jnp.einsum("oc,bcs->bos", p["wm"], xf) + p["bm"][None]     # (B,1,HW)
    attn = jax.nn.softmax(logits, axis=2)
    ctx = jnp.einsum("bcs,bos->bc", xf, attn)                           # (B,C)
    y1 = ctx @ p["w1"].T + p["b1"][:, 0]                                # (B,P)
    mu = jnp.mean(y1, axis=1, keepdims=True)
    var = jnp.mean((y1 - mu) ** 2, axis=1, keepdims=True)
    y1 = (y1 - mu) / jnp.sqrt(var + LN_EPS) * p["gamma"][:, 0] + p["beta"][:, 0]
    y1 = jnp.maximum(y1, 0.0)
    y2 = y1 @ p["w2"].T + p["b2"][:, 0]                                 # (B,C)
    return x + y2[:, :, None, None]


if __name__ == "__main__":
    B, C, H, W = 2, 32, 16, 16
    ratio = 0.25

    key = jax.random.PRNGKey(0)
    kx, kp = jax.random.split(key)
    x = jax.random.normal(kx, (B, C, H, W), jnp.float32)
    params = init_params(kp, C, ratio)

    ref = reference(x, params)

    # float32 I/O path (tight tolerance; identical math to the reference).
    out = jax.block_until_ready(global_context_block(x, params))
    assert out.shape == (B, C, H, W)
    assert jnp.allclose(out, ref, atol=1e-4, rtol=1e-4), (
        float(jnp.max(jnp.abs(out - ref))))

    # bf16 I/O path: x already bf16 in HBM (no wrapper cast pass), bf16 weights,
    # f32 accumulation / softmax / LayerNorm inside the kernel.
    x_bf16 = x.astype(jnp.bfloat16)
    out_bf16 = jax.block_until_ready(global_context_block(x_bf16, params))
    assert out_bf16.dtype == jnp.bfloat16
    assert jnp.allclose(out_bf16.astype(jnp.float32), ref, atol=5e-2, rtol=5e-2), (
        float(jnp.max(jnp.abs(out_bf16.astype(jnp.float32) - ref))))

    # Non-multiple-of-128 spatial size: unpadded (Bb, C, 100) block, no lane
    # mask, no extra pad/slice HBM passes.
    x_odd = jax.random.normal(kx, (B, C, 10, 10), jnp.float32)
    out_odd = jax.block_until_ready(global_context_block(x_odd, params))
    ref_odd = reference(x_odd, params)
    assert jnp.allclose(out_odd, ref_odd, atol=1e-4, rtol=1e-4), (
        float(jnp.max(jnp.abs(out_odd - ref_odd))))

    print("KERNEL_OK")
</pallas_src>

<mosaic_0001>
module attributes {stable_mosaic.version = 11 : i64} {
  func.func @gc_kernel(%arg0: i32, %arg1: memref<1x32x256xf32, #tpu.memory_space<vmem>>, %arg2: memref<1x1x32xf32, #tpu.memory_space<vmem>>, %arg3: memref<1x1xf32, #tpu.memory_space<smem>>, %arg4: memref<32x8xf32, #tpu.memory_space<vmem>>, %arg5: memref<1x8xf32, #tpu.memory_space<vmem>>, %arg6: memref<1x8xf32, #tpu.memory_space<vmem>>, %arg7: memref<1x8xf32, #tpu.memory_space<vmem>>, %arg8: memref<8x32xf32, #tpu.memory_space<vmem>>, %arg9: memref<1x32xf32, #tpu.memory_space<vmem>>, %arg10: memref<1x32x256xf32, #tpu.memory_space<vmem>>) attributes {dimension_semantics = [#tpu.dimension_semantics<parallel>], iteration_bounds = array<i64: 2>, scalar_prefetch = 0 : i64, scratch_operands = 0 : i64, tpu.core_type = #tpu.core_type<tc>, window_params = [{transform_indices = @transform_0, window_bounds = array<i64: 1, 32, 256>}, {pipeline_mode = #tpu.pipeline_mode<synchronous>, transform_indices = @transform_1, window_bounds = array<i64: 1, 1, 32>}, {transform_indices = @transform_2, window_bounds = array<i64: 1, 1>}, {pipeline_mode = #tpu.pipeline_mode<synchronous>, transform_indices = @transform_3, window_bounds = array<i64: 32, 8>}, {pipeline_mode = #tpu.pipeline_mode<synchronous>, transform_indices = @transform_4, window_bounds = array<i64: 1, 8>}, {pipeline_mode = #tpu.pipeline_mode<synchronous>, transform_indices = @transform_5, window_bounds = array<i64: 1, 8>}, {pipeline_mode = #tpu.pipeline_mode<synchronous>, transform_indices = @transform_6, window_bounds = array<i64: 1, 8>}, {pipeline_mode = #tpu.pipeline_mode<synchronous>, transform_indices = @transform_7, window_bounds = array<i64: 8, 32>}, {pipeline_mode = #tpu.pipeline_mode<synchronous>, transform_indices = @transform_8, window_bounds = array<i64: 1, 32>}, {transform_indices = @transform_9, window_bounds = array<i64: 1, 32, 256>}]} {
    %c0 = arith.constant 0 : index
    %c0_0 = arith.constant 0 : index
    %c0_1 = arith.constant 0 : index
    %0 = vector.load %arg1[%c0, %c0_0, %c0_1] : memref<1x32x256xf32, #tpu.memory_space<vmem>>, vector<1x32x256xf32>
    %c0_2 = arith.constant 0 : index
    %c0_3 = arith.constant 0 : index
    %c0_4 = arith.constant 0 : index
    %1 = vector.load %arg2[%c0_2, %c0_3, %c0_4] : memref<1x1x32xf32, #tpu.memory_space<vmem>>, vector<1x1x32xf32>
    "tpu.trace_start"() <{level = 10 : i32, message = "boc,bcs->bos"}> : () -> ()
    %cst = arith.constant dense<0.000000e+00> : vector<1x1x256xf32>
    %2 = tpu.matmul %1, %0, %cst {dimension_numbers = #tpu.dot_dimension_numbers<[2], [1], [1], [2], [0, 0, 0, 1, 1, 2], [0], [0]>} : vector<1x1x32xf32>, vector<1x32x256xf32>, vector<1x1x256xf32> -> vector<1x1x256xf32>
    "tpu.trace_stop"() : () -> ()
    %c0_5 = arith.constant 0 : index
    %c0_6 = arith.constant 0 : index
    %3 = memref.load %arg3[%c0_5, %c0_6] : memref<1x1xf32, #tpu.memory_space<smem>>
    %4 = vector.broadcast %3 : f32 to vector<1x1x256xf32>
    %5 = arith.addf %2, %4 : vector<1x1x256xf32>
    %cst_7 = arith.constant dense<0xFF800000> : vector<1x1xf32>
    %6 = vector.multi_reduction <maximumf>, %5, %cst_7 [2] : vector<1x1x256xf32> to vector<1x1xf32>
    %7 = vector.shape_cast %6 : vector<1x1xf32> to vector<1x1x1xf32>
    %8 = vector.broadcast %7 : vector<1x1x1xf32> to vector<1x1x256xf32>
    %9 = arith.subf %5, %8 : vector<1x1x256xf32>
    %10 = math.exp %9 : vector<1x1x256xf32>
    %cst_8 = arith.constant dense<0.000000e+00> : vector<1x1xf32>
    %11 = vector.multi_reduction <add>, %10, %cst_8 [2] : vector<1x1x256xf32> to vector<1x1xf32>
    %12 = vector.shape_cast %11 : vector<1x1xf32> to vector<1x1x1xf32>
    "tpu.trace_start"() <{level = 10 : i32, message = "bos,bcs->boc"}> : () -> ()
    %cst_9 = arith.constant dense<0.000000e+00> : vector<1x1x32xf32>
    %13 = tpu.matmul %10, %0, %cst_9 {dimension_numbers = #tpu.dot_dimension_numbers<[2], [2], [1], [1], [0, 0, 0, 1, 1, 1], [0], [0]>} : vector<1x1x256xf32>, vector<1x32x256xf32>, vector<1x1x32xf32> -> vector<1x1x32xf32>
    "tpu.trace_stop"() : () -> ()
    %14 = tpu.reciprocal %12 : vector<1x1x1xf32> -> vector<1x1x1xf32>
    %15 = vector.broadcast %14 : vector<1x1x1xf32> to vector<1x1x32xf32>
    %16 = arith.mulf %13, %15 : vector<1x1x32xf32>
    %17 = vector.shape_cast %16 : vector<1x1x32xf32> to vector<1x32xf32>
    %c0_10 = arith.constant 0 : index
    %c0_11 = arith.constant 0 : index
    %18 = vector.load %arg4[%c0_10, %c0_11] : memref<32x8xf32, #tpu.memory_space<vmem>>, vector<32x8xf32>
    %cst_12 = arith.constant dense<0.000000e+00> : vector<1x8xf32>
    %19 = tpu.matmul %17, %18, %cst_12 {dimension_numbers = #tpu.dot_dimension_numbers<[1], [0], [0], [1], [0, 0, 1, 1], [], []>} : vector<1x32xf32>, vector<32x8xf32>, vector<1x8xf32> -> vector<1x8xf32>
    %c0_13 = arith.constant 0 : index
    %c0_14 = arith.constant 0 : index
    %20 = vector.load %arg5[%c0_13, %c0_14] : memref<1x8xf32, #tpu.memory_space<vmem>>, vector<1x8xf32>
    %21 = arith.addf %19, %20 : vector<1x8xf32>
    %cst_15 = arith.constant dense<0.000000e+00> : vector<1xf32>
    %22 = vector.multi_reduction <add>, %21, %cst_15 [1] : vector<1x8xf32> to vector<1xf32>
    %23 = vector.shape_cast %22 : vector<1xf32> to vector<1x1xf32>
    %cst_16 = arith.constant 8.000000e+00 : f32
    %24 = vector.broadcast %cst_16 : f32 to vector<1x1xf32>
    %25 = arith.divf %23, %24 : vector<1x1xf32>
    %26 = vector.broadcast %25 : vector<1x1xf32> to vector<1x8xf32>
    %27 = arith.subf %21, %26 : vector<1x8xf32>
    %28 = arith.mulf %27, %27 : vector<1x8xf32>
    %cst_17 = arith.constant dense<0.000000e+00> : vector<1xf32>
    %29 = vector.multi_reduction <add>, %28, %cst_17 [1] : vector<1x8xf32> to vector<1xf32>
    %30 = vector.shape_cast %29 : vector<1xf32> to vector<1x1xf32>
    %cst_18 = arith.constant 8.000000e+00 : f32
    %31 = vector.broadcast %cst_18 : f32 to vector<1x1xf32>
    %32 = arith.divf %30, %31 : vector<1x1xf32>
    %33 = vector.broadcast %25 : vector<1x1xf32> to vector<1x8xf32>
    %34 = arith.subf %21, %33 : vector<1x8xf32>
    %cst_19 = arith.constant 9.99999974E-6 : f32
    %35 = vector.broadcast %cst_19 : f32 to vector<1x1xf32>
    %36 = arith.addf %32, %35 : vector<1x1xf32>
    %37 = math.rsqrt %36 : vector<1x1xf32>
    %38 = vector.broadcast %37 : vector<1x1xf32> to vector<1x8xf32>
    %39 = arith.mulf %34, %38 : vector<1x8xf32>
    %c0_20 = arith.constant 0 : index
    %c0_21 = arith.constant 0 : index
    %40 = vector.load %arg6[%c0_20, %c0_21] : memref<1x8xf32, #tpu.memory_space<vmem>>, vector<1x8xf32>
    %41 = arith.mulf %39, %40 : vector<1x8xf32>
    %c0_22 = arith.constant 0 : index
    %c0_23 = arith.constant 0 : index
    %42 = vector.load %arg7[%c0_22, %c0_23] : memref<1x8xf32, #tpu.memory_space<vmem>>, vector<1x8xf32>
    %43 = arith.addf %41, %42 : vector<1x8xf32>
    %cst_24 = arith.constant 0.000000e+00 : f32
    %44 = vector.broadcast %cst_24 : f32 to vector<1x8xf32>
    %45 = arith.maximumf %43, %44 : vector<1x8xf32>
    %c0_25 = arith.constant 0 : index
    %c0_26 = arith.constant 0 : index
    %46 = vector.load %arg8[%c0_25, %c0_26] : memref<8x32xf32, #tpu.memory_space<vmem>>, vector<8x32xf32>
    %cst_27 = arith.constant dense<0.000000e+00> : vector<1x32xf32>
    %47 = tpu.matmul %45, %46, %cst_27 {dimension_numbers = #tpu.dot_dimension_numbers<[1], [0], [0], [1], [0, 0, 1, 1], [], []>} : vector<1x8xf32>, vector<8x32xf32>, vector<1x32xf32> -> vector<1x32xf32>
    %c0_28 = arith.constant 0 : index
    %c0_29 = arith.constant 0 : index
    %48 = vector.load %arg9[%c0_28, %c0_29] : memref<1x32xf32, #tpu.memory_space<vmem>>, vector<1x32xf32>
    %49 = arith.addf %47, %48 : vector<1x32xf32>
    %50 = vector.shape_cast %49 : vector<1x32xf32> to vector<1x32x1xf32>
    %51 = vector.broadcast %50 : vector<1x32x1xf32> to vector<1x32x256xf32>
    %52 = arith.addf %0, %51 : vector<1x32x256xf32>
    %c0_30 = arith.constant 0 : index
    %c0_31 = arith.constant 0 : index
    %c0_32 = arith.constant 0 : index
    %53 = vector.load %arg10[%c0_30, %c0_31, %c0_32] : memref<1x32x256xf32, #tpu.memory_space<vmem>>, vector<1x32x256xf32>
    tpu.vector_store %arg10[%c0_30, %c0_31, %c0_32], %52 {strides = array<i32>} : memref<1x32x256xf32, #tpu.memory_space<vmem>>, vector<1x32x256xf32>,
    return
  }
  func.func @transform_0(%arg0: i32) -> (i32, i32, i32) {
    %c0_i32 = arith.constant 0 : i32
    %c0_i32_0 = arith.constant 0 : i32
    %c0_i32_1 = arith.constant 0 : i32
    return %arg0, %c0_i32, %c0_i32_0 : i32, i32, i32
  }
  func.func @transform_1(%arg0: i32) -> (i32, i32, i32) {
    %c0_i32 = arith.constant 0 : i32
    %c0_i32_0 = arith.constant 0 : i32
    %c0_i32_1 = arith.constant 0 : i32
    %c0_i32_2 = arith.constant 0 : i32
    return %c0_i32, %c0_i32_0, %c0_i32_1 : i32, i32, i32
  }
  func.func @transform_2(%arg0: i32) -> (i32, i32) {
    %c0_i32 = arith.constant 0 : i32
    %c0_i32_0 = arith.constant 0 : i32
    %c0_i32_1 = arith.constant 0 : i32
    return %c0_i32, %c0_i32_0 : i32, i32
  }
  func.func @transform_3(%arg0: i32) -> (i32, i32) {
    %c0_i32 = arith.constant 0 : i32
    %c0_i32_0 = arith.constant 0 : i32
    %c0_i32_1 = arith.constant 0 : i32
    return %c0_i32, %c0_i32_0 : i32, i32
  }
  func.func @transform_4(%arg0: i32) -> (i32, i32) {
    %c0_i32 = arith.constant 0 : i32
    %c0_i32_0 = arith.constant 0 : i32
    %c0_i32_1 = arith.constant 0 : i32
    return %c0_i32, %c0_i32_0 : i32, i32
  }
  func.func @transform_5(%arg0: i32) -> (i32, i32) {
    %c0_i32 = arith.constant 0 : i32
    %c0_i32_0 = arith.constant 0 : i32
    %c0_i32_1 = arith.constant 0 : i32
    return %c0_i32, %c0_i32_0 : i32, i32
  }
  func.func @transform_6(%arg0: i32) -> (i32, i32) {
    %c0_i32 = arith.constant 0 : i32
    %c0_i32_0 = arith.constant 0 : i32
    %c0_i32_1 = arith.constant 0 : i32
    return %c0_i32, %c0_i32_0 : i32, i32
  }
  func.func @transform_7(%arg0: i32) -> (i32, i32) {
    %c0_i32 = arith.constant 0 : i32
    %c0_i32_0 = arith.constant 0 : i32
    %c0_i32_1 = arith.constant 0 : i32
    return %c0_i32, %c0_i32_0 : i32, i32
  }
  func.func @transform_8(%arg0: i32) -> (i32, i32) {
    %c0_i32 = arith.constant 0 : i32
    %c0_i32_0 = arith.constant 0 : i32
    %c0_i32_1 = arith.constant 0 : i32
    return %c0_i32, %c0_i32_0 : i32, i32
  }
  func.func @transform_9(%arg0: i32) -> (i32, i32, i32) {
    %c0_i32 = arith.constant 0 : i32
    %c0_i32_0 = arith.constant 0 : i32
    %c0_i32_1 = arith.constant 0 : i32
    return %arg0, %c0_i32, %c0_i32_0 : i32, i32, i32
  }
}

</mosaic_0001>

<bundles_post_ra>
// kernel: tpu_custom_call.1
= control target key start
LH: loop header
LB: loop body
LE: loop exit
PB: predicated region body
PF: predicated region fallthrough
CT: control target
= control target key end

     0   :  { %s1346_s0 = inlined_call_operand.hbm [shape: f32[2,32,256], index: 0, kind: input, shape index: {}]   ;;  %s1347_s1 = inlined_call_operand.vmem [shape: f32[1,1,32], index: 1, kind: input, shape index: {}]   ;;  %s1348_s2 = inlined_call_operand.<no memory space> [shape: f32[1,1], index: 2, kind: input, shape index: {}]   ;;  %s1349_s3 = inlined_call_operand.vmem [shape: f32[32,8], index: 3, kind: input, shape index: {}]   ;;  %s1350_s4 = inlined_call_operand.vmem [shape: f32[1,8], index: 4, kind: input, shape index: {}]   ;;  %s1351_s5 = inlined_call_operand.vmem [shape: f32[1,8], index: 5, kind: input, shape index: {}]   ;;  %s1352_s6 = inlined_call_operand.vmem [shape: f32[1,8], index: 6, kind: input, shape index: {}]   ;;  %s1353_s7 = inlined_call_operand.vmem [shape: f32[8,32], index: 7, kind: input, shape index: {}]   ;;  %s1354_s8 = inlined_call_operand.vmem [shape: f32[1,32], index: 8, kind: input, shape index: {}]   ;;  %s1355_s9 = inlined_call_operand.hbm [shape: f32[2,32,256], index: 9, kind: output, shape index: {}]  }
   0x1   :  { %14 = sst [smem:[#allocation2]] %s1348_s2 }
   0x2   :  { %15 = vsyncpa [#allocation4], 0 }
   0x3   :  { %17 = vsyncpa [#allocation4 + $0x1], 0 }
   0x4   :  { %18 = vsyncpa [#allocation5], 0 }
   0x5   :  { %20 = vsyncpa [#allocation5 + $0x1], 0  ;;  %s1108_s11 = smov 0   ;;  %s1110_s12 = smov 0  }
   0x6   :  { %s1112_s13 = smov 0   ;;  %s1114_s14 = smov 0  }
   0x7 LB: > { %s1129_s2 = sadd.s32 4294967295, %s1044_s14   ;;  %s823_s15 = sadd.s32 4294967294, %s1044_s14   ;;  %s1044_s14 = sphi %s1114_s14, %s1368_s14   ;;  %s1040_s13 = sphi %s1112_s13, %s1367_s13   ;;  %s1036_s12 = sphi %s1110_s12, %s1366_s12   ;;  %s1032_s11 = sphi %s1108_s11, %s1365_s11  }
   0x8   : > { %s1133_s16 = sadd.s32 1, %s1044_s14   ;;  %s33_s17 = sadd.s32 1, %s1040_s13 }
   0x9   : > { %s30_s18 = ssub.s32 %s1044_s14, %s1133_s16  ;;  %p40_p0 = scmp.ne.s32.totalorder %s1040_s13, %s1036_s12 }
   0xa   : > { %p31_p1 = scmp.eq.s32.totalorder %s30_s18, 0  ;;  %p41_p2 = scmp.eq.s32.totalorder %s1044_s14, 0 }
   0xb   : > { %p46_p3 = scmp.ne.s32.totalorder %s1036_s12, %s1032_s11  ;;  %p47_p4 = scmp.eq.s32.totalorder %s1129_s2, 0 }
   0xc   : > { %s1145_s19 = scalar_select %p31_p1, %s1040_s13, %s33_s17  }
   0xd   : > { %p1147_p5 = por %p41_p2, %p40_p0  ;;  %p1151_p6 = por %p47_p4, %p46_p3 }
   0xe   : > { %p238_p7 = scmp.eq.s32.totalorder %s1129_s2, 1  ;;  %p244_p8 = scmp.eq.s32.totalorder %s823_s15, 1 }
   0xf   : > { %p899_p10 = scmp.lt.s32.totalorder %s1044_s14, 2  ;;  %s288_s24 = sand.u32 1, %s1040_s13  }
  0x10   : > { %p1158_p11 = por %p238_p7, %p40_p0  ;;  %p1162_p12 = por %p244_p8, %p46_p3 }
  0x11   : > { %s840_s25 = sshll.u32 %s1044_s14, 10  ;;  %s826_s26 = sshll.u32 %s288_s24, 6 }
  0x12   : > { %s1359_s22 = scalar_select %p1158_p11, 1, 0 }
  0x13   : > { %s1360_s23 = scalar_select %p1162_p12, 1, 0 }
  0x14   : > { %s1171_s29 = scalar_lea.hbm %s1346_s0, %s840_s25  ;;  %s292_s30 = scalar_lea.vmem [#allocation3], %s826_s26 }
  0x15   : > { %s299_s10 = sshll.u32 %s292_s30, 4  ;;  %p1175_p13 = pnand %p899_p10, %p1147_p5  ;;  %s1179_s10 = int_to_ptr.vmem [resolvable:$true] %s299_s10 }
  0x16   : > { %s1181_s17 = scalar_lea.sflag [#allocation4], %s288_s24  ;;  %s948_s18 = scalar_lea.hbm %s1171_s29, 1024 }
  0x17   : > { %p949_p0 = scmp.ne.s32.totalorder %s1171_s29, %s948_s18  ;;  %p950_p1 = pneg %p1175_p13 }
  0x18   : > { %s953_s26 = scalar_lea.hbm %s1346_s0, 2048  ;;  %p954_p4 = scmp.lt.u32.totalorder %s1171_s29, %s1346_s0 }
  0x19   : > { %p951_p2 = pnand %p950_p1, %p949_p0  ;;  %p955_p5 = scmp.lt.u32.totalorder %s953_s26, %s948_s18 }
  0x1a   : > { %p957_p8 = scmp.lt.u32.totalorder %s948_s18, %s1171_s29 }
  0x1b   : > { %p952_p3 = pneg %p951_p2  ;;  %p956_p7 = por %p955_p5, %p954_p4 }
  0x1d   : > { %p958_p10 = por %p957_p8, %p956_p7 }
  0x1f   : > { %p959_p9 = pnand %p958_p10, %p952_p3 }
  0x21   : > { %962 = shalt.err (!%p959_p9)
}
  0x22   : > { %s963_s24 = scalar_lea.vmem %s1179_s10, 1024  ;;  %s1046_s30 = smov [#allocation3]  }
  0x23   : > { %p964_p0 = scmp.ne.s32.totalorder %s1179_s10, %s963_s24  ;;  %s968_s25 = sshll.u32 %s1046_s30, 4  ;;  %s969_s25 = int_to_ptr.vmem [resolvable:$false] %s968_s25 }
  0x24   : > { %s970_s20 = scalar_lea.vmem %s969_s25, 2048  ;;  %p971_p11 = scmp.lt.s32.totalorder %s1179_s10, %s969_s25 }
  0x25   : > { %p966_p2 = pnand %p964_p0, %p950_p1  ;;  %p972_p4 = scmp.lt.s32.totalorder %s970_s20, %s963_s24 }
  0x27   : > { %p967_p12 = pneg %p966_p2  ;;  %p973_p5 = por %p972_p4, %p971_p11 }
  0x29   : > { %p974_p7 = pnand %p973_p5, %p967_p12 }
  0x2b   : > { %977 = shalt.err (!%p974_p7)
}
  0x2c   : > { %s1047_s18 = smov 256   ;;  %s1048_s26 = smov 16  }
  0x2d   : > { %894 = dma.hbm_to_vmem [thread:$0]  (!%p1175_p13), %s1171_s29, 1024, %s1179_s10, %s1181_s17, %s1047_s18, %s1047_s18, %s1048_s26  }
  0x2e   : > { %p829_p9 = scmp.ge.s32.totalorder %s1044_s14, 1  ;;  %p307_p1 = scmp.lt.s32.totalorder %s1044_s14, 3 }
  0x30   : > { %p308_p3 = pnand %p829_p9, %p307_p1 }
  0x31   : > { %s1212_s27 = sand.u32 (!%p308_p3), 1, %s1036_s12  }
  0x32   : > { %311 = sbr.rel (%p308_p3) target bundleno = 1545 (0x609), region = 56  ;;  %s830_s28 = sshll.u32 (!%p308_p3), %s1212_s27, 6 }
  0x33   : > { %s314_s24 = scalar_lea.sflag (!%p308_p3), [#allocation4], %s1212_s27  ;;  %s317_s30 = scalar_lea.vmem (!%p308_p3), [#allocation3], %s830_s28 }
  0x39   : > { %1023 = dma.done.wait (%p1151_p6), %s314_s24, 1024  }
  0x3a   : > { %1025 = vsyncadd (%p1151_p6), %s314_s24, 4294966272  ;;  %v1049_v0 = vmov 0.0   ;;  %v1223_v1 = vld [vmem:[%s317_s30 + $0x8] sm:$0xff]  ;;  %v1225_v2 = vld [vmem:[%s317_s30 + $0x18] sm:$0xff]  ;;  %vm363_vm0 = vcmask 261120   ;;  %s361_s10 = sld [smem:[#allocation2]] }
  0x3b   : > { %431 = vmatprep.mubr.f32.mxu0 %v1049_v0  ;;  %v1227_v3 = vld [vmem:[%s317_s30] sm:$0xff]  ;;  %v865_v4 = vpack.c.bf16 %v1225_v2, %v1223_v1  ;;  %v1231_v5 = vld [vmem:[%s317_s30 + $0x10] sm:$0xff]  ;;  %v1233_v6 = vld [vmem:[%s317_s30 + $0x28] sm:$0xff]  ;;  %vm438_vm1 = vcmask 1040384   ;;  %v1050_v34 = vmov 0.0|0.0   ;;  %vm1051_vm2 = vmmov 0  }
  0x3c   : > { %v1235_v7 = vld [vmem:[%s317_s30 + $0x38] sm:$0xff]  ;;  %v867_v8 = vpack.c.bf16 %v1231_v5, %v1227_v3  ;;  %v1241_v10 = vld [vmem:[%s317_s30 + $0x20] sm:$0xff]  ;;  %v1243_v11 = vld [vmem:[%s317_s30 + $0x30] sm:$0xff]  ;;  %vm605_vm3 = vcmask 57344   ;;  %vm627_vm4 = vcmask 64512   ;;  %s351_s30 = scalar_lea.vmem [#allocation6], %s830_s28 }
  0x3d   : > { %v869_v9 = vpack.c.bf16 %v1235_v7, %v1233_v6  ;;  %866 = vmatprep.subr.bf16.mxu0 %v865_v4  ;;  %874 = vmatprep.subr.bf16.mxu1 %v865_v4  ;;  %v871_v12 = vpack.c.bf16 %v1243_v11, %v1241_v10  ;;  %v360_v13 = vld [vmem:[%s1347_s1] sm:$0x1]  ;;  %v528_v33 = vld [vmem:[%s1349_s3 + $0x8] sm:$0xff]  ;;  %v529_v36 = vld [vmem:[%s1349_s3 + $0x10] sm:$0xff]  ;;  %v701_v4 = vlaneseq  ;;  %s750_s21 = sshll.u32 %s351_s30, 4  ;;  %s841_s29 = sshll.u32 %s1129_s2, 10  ;;  %s1295_s21 = int_to_ptr.vmem [resolvable:$true] %s750_s21 }
  0x3e   : > { %868 = vmatpush1.bf16.msra.mxu0 %v867_v8  ;;  %876 = vmatpush1.bf16.xpose.msra.mxu1 %v867_v8  ;;  %v527_v32 = vld [vmem:[%s1349_s3] sm:$0xff]  ;;  %v530_v37 = vld [vmem:[%s1349_s3 + $0x18] sm:$0xff]  ;;  %s1300_s15 = scalar_lea.hbm %s1355_s9, %s841_s29  ;;  %s737_s2 = scalar_lea.sflag [#allocation5], %s1212_s27 }
  0x3f   : > { %870 = vmatprep.subr.bf16.mxu0 %v869_v9  ;;  %878 = vmatprep.subr.bf16.mxu1 %v869_v9  ;;  %v882_v35 = vpack.c.bf16 %v528_v33, %v527_v32  ;;  %v885_v38 = vpack.c.bf16 %v530_v37, %v529_v36  ;;  %v531_v44 = vld [vmem:[%s1350_s4] sm:$0x1]  ;;  %v702_v8 = vshrl.u32 %v701_v4, 7  ;;  %s978_s17 = scalar_lea.vmem %s1295_s21, 1024  ;;  %p1362_p11 = scmp.ne.s32.totalorder %s1359_s22, 0 }
  0x40   : > { %v362_v14 = vstv %s361_s10  ;;  %v625_v54 = vld [vmem:[%s1353_s7] sm:$0xff]  ;;  %p979_p6 = scmp.ne.s32.totalorder %s1295_s21, %s978_s17  ;;  %s1052_s25 = smov [#allocation6]  }
  0x41   : > { %v620_v59 = vld [vmem:[%s1351_s5] sm:$0x1]  ;;  %s982_s20 = sshll.u32 %s1052_s25, 4  ;;  %s983_s20 = int_to_ptr.vmem [resolvable:$false] %s982_s20 }
  0x42   : > { %872 = vmatpush1.bf16.msra.mxu0 %v871_v12  ;;  %v622_v61 = vld [vmem:[%s1352_s6] sm:$0x1]  ;;  %p980_p12 = pnand %p979_p6, %p1362_p11  ;;  %s984_s18 = scalar_lea.vmem %s983_s20, 2048 }
  0x43   : > { %881 = vmatprep.subr.bf16.mxu0 %v1050_v34  ;;  %v626_v9 = vld [vmem:[%s1354_s8] sm:$0x1]  ;;  %p985_p8 = scmp.lt.s32.totalorder %s1295_s21, %s983_s20  ;;  %p986_p10 = scmp.lt.s32.totalorder %s984_s18, %s978_s17 }
  0x44   : > { %p981_p13 = pneg %p980_p12 }
  0x45   : > { %832 = vmatmul.mubr.msk.f32.vlgmr.msra.gmra.mrb[0].mxu0 %vm363_vm0, %v360_v13  ;;  %p987_p0 = por %p986_p10, %p985_p8 }
  0x46   : > { %880 = vmatpush1.bf16.xpose.msra.mxu1 %v871_v12  ;;  %883 = vmatpush3.bf16.msra.mxu0 %v882_v35  ;;  %v703_v12 = vsub.s32 0, %v702_v8 }
  0x47   : > { %884 = vmatprep.subr.bf16.mxu0 %v1050_v34  ;;  %857 = vmatprep.mubr.msk.f32.mxu0 %vm1051_vm2, %v1049_v0  ;;  %p988_p2 = pnand %p987_p0, %p981_p13 }
  0x4a   : > { %886 = vmatpush3.bf16.msra.mxu0 %v885_v38 }
  0x4b   : > { %860 = vmatprep.subr.mxu0 %v1049_v0 }
 0x118   : > { %v433_v15 = vpop.f32.mrb[0].mxu0 }
 0x119   : > { %v434_v16 = vadd.f32 %v433_v15, %v362_v14  ;;  %v435_v17 = vpop.f32.mrb[1].mxu0 }
 0x11a   : > { %v436_v18 = vadd.f32 %v435_v17, %v362_v14 }
 0x11b   : > { %v439_v19 = vsel %vm438_vm1, %v434_v16, -inf }
 0x11c   : > { %v440_v20 = vsel %vm438_vm1, %v436_v18, -inf }
 0x11d   : > { %v441_v21 = vmax.f32 %v439_v19, %v440_v20 }
 0x11f   : > { %442 = vmax.xlane.f32.xlu0 %v441_v21 }
 0x1ac   : > { %v443_v22 = vpop.xlane.xlu0 %442 }
 0x1ad   : > { %v444_v23 = vsub.f32 %v434_v16, %v443_v22  ;;  %v445_v24 = vsub.f32 %v436_v18, %v443_v22 }
 0x1af   : > { %v446_v25 = vmul.f32 1.442695, %v444_v23  ;;  %v448_v26 = vmul.f32 1.442695, %v445_v24 }
 0x1b1   : > { %940 = vpow2.f32 %v446_v25 }
 0x1b2   : > { %942 = vpow2.f32 %v448_v26 }
 0x1bb   : > { %v941_v27 = vpop.eup %940 }
 0x1bc   : > { %v943_v28 = vpop.eup %942  ;;  %v450_v29 = vsel %vm438_vm1, %v941_v27, 0.0 }
 0x1bd   : > { %519 = vmatprep.mubr.f32.mxu1 %v943_v28  ;;  %v451_v30 = vsel %vm438_vm1, %v943_v28, 0.0 }
 0x1be   : > { %520 = vmatmul.mubr.f32.vlgmr.msra.gmra.mrb[0].mxu1 %v941_v27  ;;  %v452_v31 = vadd.f32 %v451_v30, %v450_v29 }
 0x1c0   : > { %453 = vadd.xlane.f32.xlu0 %v452_v31 }
 0x24d   : > { %v454_v39 = vpop.xlane.xlu0 %453 }
 0x24e   : > { %944 = vrcp.f32 %v454_v39 }
 0x258   : > { %v945_v40 = vpop.eup %944 }
 0x291   : > { %v521_v41 = vpop.f32.mrb[0].mxu1 }
 0x292   : > { %v526_v42 = vmul.f32 %v945_v40, %v521_v41  ;;  %v523_v43 = vpop.f32.mrb[1].mxu1 }
 0x294   : > { %858 = vmatmul.mubr.msk.f32.vlgmr.msra.gmra.mrb[2].mxu0 %vm363_vm0, %v526_v42 }
 0x295   : > { %862 = vmatprep.mubr.msk.f32.mxu0 %vm1051_vm2, %v1049_v0  ;;  %861 = vmatpush3.msra.mxu0 %v625_v54 }
 0x367   : > { %v601_v45 = vpop.f32.mrb[2].mxu0 }
 0x368   : > { %v602_v46 = vadd.f32 %v601_v45, %v531_v44  ;;  %v859_v47 = vpop.f32.mrb[3].mxu0 }
 0x36a   : > { %v606_v48 = vsel %vm605_vm3, %v602_v46, 0.0 }
 0x36b   : > { %607 = vadd.xlane.f32.xlu1 %v606_v48 }
 0x3f8   : > { %v608_v49 = vpop.xlane.xlu1 %607 }
 0x3f9   : > { %v610_v50 = vmul.f32 0.125, %v608_v49 }
 0x3fb   : > { %v611_v51 = vsub.f32 %v602_v46, %v610_v50 }
 0x3fd   : > { %v612_v52 = vmul.f32 %v611_v51, %v611_v51 }
 0x3ff   : > { %v613_v53 = vsel %vm605_vm3, %v612_v52, 0.0 }
 0x400   : > { %614 = vadd.xlane.f32.xlu1 %v613_v53 }
 0x48d   : > { %v615_v55 = vpop.xlane.xlu1 %614 }
 0x48e   : > { %v616_v56 = vmul.f32 0.125, %v615_v55 }
 0x490   : > { %v617_v57 = vadd.f32 1e-05, %v616_v56 }
 0x492   : > { %946 = vrsqrt.f32 %v617_v57 }
 0x49c   : > { %v947_v58 = vpop.eup %946 }
 0x49d   : > { %v619_v60 = vmul.f32 %v947_v58, %v611_v51 }
 0x49f   : > { %v621_v62 = vmul.f32 %v620_v59, %v619_v60 }
 0x4a1   : > { %v623_v63 = vadd.f32 %v622_v61, %v621_v62 }
 0x4a3   : > { %v624_v0 = vmax.f32 %v623_v63, 0.0 }
 0x4a5   : > { %863 = vmatmul.mubr.msk.f32.vlgmr.msra.gmra.mrb[4].mxu0 %vm627_vm4, %v624_v0 }
 0x578   : > { %v697_v13 = vpop.f32.mrb[4].mxu0 }
 0x579   : > { %v698_v14 = vadd.f32 %v697_v13, %v626_v9  ;;  %v864_v15 = vpop.f32.mrb[5].mxu0 }
 0x57b   : > { %v704_v16 = vrot.slane %v698_v14, %v703_v12 }
 0x57d   : > { %710 = vbcast.lane.b32.xlu1 %v704_v16, 264  ;;  %706 = vbcast.lane.b32.xlu0 %v704_v16, 256 }
 0x581   : > { %714 = vbcast.lane.b32.xlu1 %v704_v16, 272 }
 0x585   : > { %718 = vbcast.lane.b32.xlu1 %v704_v16, 280 }
 0x5ef   : > { %v711_v17 = vpop.permute.xlu1 %710  ;;  %v707_v18 = vpop.permute.xlu0 %706 }
 0x5f0   : > { %v722_v19 = vadd.f32 %v711_v17, %v1231_v5  ;;  %v723_v20 = vadd.f32 %v711_v17, %v1225_v2  ;;  %v720_v21 = vadd.f32 %v707_v18, %v1227_v3  ;;  %v721_v22 = vadd.f32 %v707_v18, %v1223_v1 }
 0x5f2   : > { %730 = vst [vmem:[%s351_s30 + $0x10] sm:$0xff] %v722_v19  ;;  %731 = vst [vmem:[%s351_s30 + $0x18] sm:$0xff] %v723_v20 }
 0x5f3   : > { %728 = vst [vmem:[%s351_s30] sm:$0xff] %v720_v21  ;;  %729 = vst [vmem:[%s351_s30 + $0x8] sm:$0xff] %v721_v22  ;;  %v715_v23 = vpop.permute.xlu1 %714 }
 0x5f4   : > { %v724_v24 = vadd.f32 %v715_v23, %v1241_v10  ;;  %v725_v5 = vadd.f32 %v715_v23, %v1233_v6 }
 0x5f6   : > { %732 = vst [vmem:[%s351_s30 + $0x20] sm:$0xff] %v724_v24  ;;  %733 = vst [vmem:[%s351_s30 + $0x28] sm:$0xff] %v725_v5 }
 0x5f7   : > { %v719_v1 = vpop.permute.xlu1 %718 }
 0x5f8   : > { %v726_v2 = vadd.f32 %v719_v1, %v1243_v11  ;;  %v727_v3 = vadd.f32 %v719_v1, %v1235_v7 }
 0x5fa   : > { %734 = vst [vmem:[%s351_s30 + $0x30] sm:$0xff] %v726_v2  ;;  %735 = vst [vmem:[%s351_s30 + $0x38] sm:$0xff] %v727_v3 }
 0x5fb   : > { %991 = shalt.err (!%p988_p2)
}
 0x5fc   : > { %s992_s26 = scalar_lea.hbm %s1300_s15, 1024  ;;  %s996_s29 = scalar_lea.hbm %s1355_s9, 2048 }
 0x5fd   : > { %p993_p4 = scmp.ne.s32.totalorder %s1300_s15, %s992_s26  ;;  %p997_p9 = scmp.lt.u32.totalorder %s1300_s15, %s1355_s9 }
 0x5fe   : > { %p998_p1 = scmp.lt.u32.totalorder %s996_s29, %s992_s26  ;;  %p1000_p6 = scmp.lt.u32.totalorder %s992_s26, %s1300_s15 }
 0x5ff   : > { %p994_p5 = pnand %p993_p4, %p1362_p11 }
 0x600   : > { %p999_p3 = por %p998_p1, %p997_p9 }
 0x601   : > { %p995_p7 = pneg %p994_p5 }
 0x602   : > { %p1001_p12 = por %p1000_p6, %p999_p3 }
 0x604   : > { %p1002_p13 = pnand %p1001_p12, %p995_p7 }
 0x606   : > { %1005 = shalt.err (!%p1002_p13)
}
 0x607   : > { %s1053_s17 = smov 256   ;;  %s1054_s25 = smov 16  }
 0x608   : > { %889 = dma.vmem_to_hbm [thread:$0]  (%p1362_p11), %s1295_s21, 1024, %s1300_s15, %s737_s2, %s1053_s17, %s1053_s17, %s1054_s25  }
 0x609 PF: > { %s765_s20 = sand.u32 1, %s1032_s11   ;;  %p1363_p8 = scmp.ne.s32.totalorder %s1360_s23, 0 }
 0x60a   : > { %p1364_p10 = scmp.ge.s32.totalorder %s1044_s14, 2  ;;  %s766_s18 = scalar_lea.sflag [#allocation5], %s765_s20 }
 0x60c   : > { %p896_p0 = pnand %p1364_p10, %p1363_p8 }
 0x60e   : > { %1027 = dma.done.wait (!%p896_p0), %s766_s18, 1024  }
 0x60f   : > { %1029 = vsyncadd (!%p896_p0), %s766_s18, 4294966272  ;;  %p23_p2 = scmp.ge.s32.totalorder %s1133_s16, 4   ;;  %s1365_s11 = smov %s1036_s12 }
 0x610   : > { %s1366_s12 = smov %s1040_s13  ;;  %s1367_s13 = smov %s1145_s19 }
 0x611   : > { %s1368_s14 = smov %s1133_s16  ;;  %25 = sbr.rel (!%p23_p2) target bundleno = 7 (0x7), region = 101 }
 0x618   :  { %771 = vsyncpa [#allocation4], 1 }
 0x619   :  { %773 = vsyncpa [#allocation4 + $0x1], 1 }
 0x61a   :  { %774 = vsyncpa [#allocation5], 1 }
 0x61b   :  { %776 = vsyncpa [#allocation5 + $0x1], 1 }

</bundles_post_ra>
